<compile_context>
chip_gen: v7x
topology: tpu7x:2x2x1
jax: 0.10.0
libtpu: 0.0.40
codegen_flags: <defaults>
</compile_context>

<pallas_src>
import jax
import jax.numpy as jnp
from jax.experimental import pallas as pl
from jax.experimental.pallas import tpu as pltpu

PAD_IDX = 0


# ------------------------------ Pallas kernel ------------------------------ #

def _input_attention_kernel(ctx_ref, wemb_ref, cemb_ref,
                            w1_ref, b1_ref, w2_ref, b2_ref,
                            mask_ref, att_ref):
    """Fused InputAttention forward for one batch tile.

    ctx_ref:  (BB, T)     int32 context token ids
    wemb_ref: (BB, E)     f32 word embeddings
    cemb_ref: (BB, T, E)  bf16 context embeddings (matmul operand only)
    w1_ref:   (E, H) bf16, b1_ref: (1, H) f32   -- ann Linear (pre-transposed)
    w2_ref:   (H, E) bf16, b2_ref: (1, E) f32   -- a_linear   (pre-transposed)
    mask_ref / att_ref: (BB, E) f32 outputs
    """
    BB, T, E = cemb_ref.shape
    H = w1_ref.shape[1]

    # Validity mask + lengths from token ids (VPU compare; no mask DMA).
    valid = (ctx_ref[...] != PAD_IDX).astype(jnp.float32)           # (BB, T)
    lengths = jnp.sum(valid, axis=1, keepdims=True)                 # (BB, 1)
    inv_len = pl.reciprocal(lengths, approx=True)                   # EUP, ~free

    # ann: Dropout(identity) -> Linear(E->H) -> tanh.
    # One MXU pass over all BB*T rows (bf16 operands, f32 accumulation).
    x = cemb_ref[...].reshape(BB * T, E)                            # bf16
    h = jnp.tanh(jnp.dot(x, w1_ref[...],
                         preferred_element_type=jnp.float32) + b1_ref[...])
    h = h.reshape(BB, T, H)                                         # f32

    # Masked mean over time (pack/pad bookkeeping of the torch module).
    pooled = jnp.sum(h * valid[:, :, None], axis=1) * inv_len       # (BB, H)

    # a_linear: Linear(H->E) -> sigmoid.
    logits = jnp.dot(pooled.astype(w2_ref.dtype), w2_ref[...],
                     preferred_element_type=jnp.float32) + b2_ref[...]
    gate = jax.nn.sigmoid(logits)                                   # (BB, E)

    mask_ref[...] = gate
    att_ref[...] = gate * wemb_ref[...]


# ------------------------------- JAX wrapper -------------------------------- #

def input_attention_forward(word, context, params, *, block_b=8):
    emb_table = params['embedding']
    E = emb_table.shape[1]
    B, T = context.shape
    H = params['w_ann'].shape[1]

    # Embedding gathers kept as XLA glue at these small sizes; the big context
    # slab is narrowed to bf16 so the MXU runs its native fast path and the
    # HBM->VMEM DMA bytes are halved.
    # TODO(synk): at real sizes, replace with a scalar-prefetched in-kernel gather.
    word_embs = jnp.take(emb_table, word, axis=0).astype(jnp.float32)          # (B, E)
    context_embs = jnp.take(emb_table, context, axis=0).astype(jnp.bfloat16)   # (B, T, E)
    context_ids = context.astype(jnp.int32)                                    # (B, T)

    bb = min(block_b, B)
    assert B % bb == 0, "batch must be divisible by the batch block"
    grid = (B // bb,)

    mask_out, att_out = pl.pallas_call(
        _input_attention_kernel,
        out_shape=(jax.ShapeDtypeStruct((B, E), jnp.float32),
                   jax.ShapeDtypeStruct((B, E), jnp.float32)),
        grid=grid,
        in_specs=[
            pl.BlockSpec((bb, T), lambda i: (i, 0)),        # context token ids
            pl.BlockSpec((bb, E), lambda i: (i, 0)),        # word embeddings
            pl.BlockSpec((bb, T, E), lambda i: (i, 0, 0)),  # context embeddings (bf16)
            pl.BlockSpec((E, H), lambda i: (0, 0)),         # w_ann (pre-transposed, bf16)
            pl.BlockSpec((1, H), lambda i: (0, 0)),         # b_ann
            pl.BlockSpec((H, E), lambda i: (0, 0)),         # w_a   (pre-transposed, bf16)
            pl.BlockSpec((1, E), lambda i: (0, 0)),         # b_a
        ],
        out_specs=(pl.BlockSpec((bb, E), lambda i: (i, 0)),
                   pl.BlockSpec((bb, E), lambda i: (i, 0))),
        compiler_params=pltpu.CompilerParams(
            dimension_semantics=("parallel",)),
    )(context_ids, word_embs, context_embs,
      params['w_ann_bf16'], params['b_ann'],
      params['w_a_bf16'], params['b_a'])

    return mask_out, att_out


# --------------------------- deterministic params --------------------------- #

def init_params(key, vocab, E, H):
    """Mirrors InputAttention.init_attn (embedding uniform, xavier linears, zero bias)."""
    k_emb, k_ann, k_a = jax.random.split(key, 3)

    initrange = 0.5 / E
    embedding = jax.random.uniform(k_emb, (vocab, E), jnp.float32, -initrange, initrange)
    embedding = embedding.at[PAD_IDX].set(0.0)          # nn.Embedding padding_idx row

    def xavier_uniform(k, fan_out, fan_in):
        bound = jnp.sqrt(6.0 / (fan_in + fan_out))
        return jax.random.uniform(k, (fan_out, fan_in), jnp.float32, -bound, bound)

    # Store weights PRE-TRANSPOSED (in, out) so the forward never calls .T,
    # and pre-cast bf16 copies for the MXU operands.
    w_ann = xavier_uniform(k_ann, H, E).T                # (E, H)
    w_a = xavier_uniform(k_a, E, H).T                    # (H, E)
    return dict(
        embedding=embedding,
        w_ann=w_ann, b_ann=jnp.zeros((1, H), jnp.float32),
        w_a=w_a, b_a=jnp.zeros((1, E), jnp.float32),
        w_ann_bf16=w_ann.astype(jnp.bfloat16),
        w_a_bf16=w_a.astype(jnp.bfloat16),
    )


# ----------------------------- pure-JAX reference --------------------------- #

def reference_forward(word, context, params):
    emb_table = params['embedding']
    we = jnp.take(emb_table, word, axis=0)                              # (B, E)
    ce = jnp.take(emb_table, context, axis=0)                           # (B, T, E)
    valid = (context != PAD_IDX).astype(jnp.float32)                    # (B, T)
    lengths = jnp.sum(valid, axis=1, keepdims=True)                     # (B, 1)
    h = jnp.tanh(ce @ params['w_ann'] + params['b_ann'])                # (B, T, H)
    pooled = jnp.sum(h * valid[:, :, None], axis=1) / lengths           # (B, H)
    logits = pooled @ params['w_a'] + params['b_a']                     # (B, E)
    mask = jax.nn.sigmoid(logits)
    return mask, mask * we


# ---------------------------------- main ------------------------------------ #

if __name__ == "__main__":
    key = jax.random.PRNGKey(0)
    VOCAB, E, H, T, B = 50, 32, 16, 16, 16
    kp, kw, kc, kl = jax.random.split(key, 4)

    params = init_params(kp, VOCAB, E, H)

    word = jax.random.randint(kw, (B,), 1, VOCAB)                     # (B,) word ids
    lengths = jax.random.randint(kl, (B,), 1, T + 1)                  # valid lengths in [1, T]
    tok = jax.random.randint(kc, (B, T), 1, VOCAB)                    # (B, T) context ids
    valid = jnp.arange(T)[None, :] < lengths[:, None]
    context = jnp.where(valid, tok, PAD_IDX)

    mask, att = input_attention_forward(word, context, params, block_b=8)
    jax.block_until_ready((mask, att))

    mask_ref, att_ref = reference_forward(word, context, params)
    assert mask.shape == (B, E) and att.shape == (B, E)
    assert jnp.allclose(mask, mask_ref, atol=5e-3, rtol=5e-3), "mask mismatch vs reference"
    assert jnp.allclose(att, att_ref, atol=5e-3, rtol=5e-3), "att mismatch vs reference"
    print("KERNEL_OK")
</pallas_src>

<mosaic_0001>
module attributes {stable_mosaic.version = 11 : i64} {
  func.func @_input_attention_kernel(%arg0: i32, %arg1: memref<8x16xi32, #tpu.memory_space<vmem>>, %arg2: memref<8x32xf32, #tpu.memory_space<vmem>>, %arg3: memref<8x16x32xbf16, #tpu.memory_space<vmem>>, %arg4: memref<32x16xbf16, #tpu.memory_space<vmem>>, %arg5: memref<1x16xf32, #tpu.memory_space<vmem>>, %arg6: memref<16x32xbf16, #tpu.memory_space<vmem>>, %arg7: memref<1x32xf32, #tpu.memory_space<vmem>>, %arg8: memref<8x32xf32, #tpu.memory_space<vmem>>, %arg9: memref<8x32xf32, #tpu.memory_space<vmem>>) attributes {dimension_semantics = [#tpu.dimension_semantics<parallel>], iteration_bounds = array<i64: 2>, scalar_prefetch = 0 : i64, scratch_operands = 0 : i64, tpu.core_type = #tpu.core_type<tc>, window_params = [{transform_indices = @transform_0, window_bounds = array<i64: 8, 16>}, {transform_indices = @transform_1, window_bounds = array<i64: 8, 32>}, {transform_indices = @transform_2, window_bounds = array<i64: 8, 16, 32>}, {pipeline_mode = #tpu.pipeline_mode<synchronous>, transform_indices = @transform_3, window_bounds = array<i64: 32, 16>}, {pipeline_mode = #tpu.pipeline_mode<synchronous>, transform_indices = @transform_4, window_bounds = array<i64: 1, 16>}, {pipeline_mode = #tpu.pipeline_mode<synchronous>, transform_indices = @transform_5, window_bounds = array<i64: 16, 32>}, {pipeline_mode = #tpu.pipeline_mode<synchronous>, transform_indices = @transform_6, window_bounds = array<i64: 1, 32>}, {transform_indices = @transform_7, window_bounds = array<i64: 8, 32>}, {transform_indices = @transform_8, window_bounds = array<i64: 8, 32>}]} {
    %c0 = arith.constant 0 : index
    %c0_0 = arith.constant 0 : index
    %0 = vector.load %arg1[%c0, %c0_0] : memref<8x16xi32, #tpu.memory_space<vmem>>, vector<8x16xi32>
    %c0_i32 = arith.constant 0 : i32
    %1 = vector.broadcast %c0_i32 : i32 to vector<8x16xi32>
    %2 = arith.cmpi ne, %0, %1 : vector<8x16xi32>
    %3 = arith.extui %2 : vector<8x16xi1> to vector<8x16xi32>
    %4 = arith.sitofp %3 : vector<8x16xi32> to vector<8x16xf32>
    %cst = arith.constant dense<0.000000e+00> : vector<8xf32>
    %5 = vector.multi_reduction <add>, %4, %cst [1] : vector<8x16xf32> to vector<8xf32>
    %6 = vector.shape_cast %5 : vector<8xf32> to vector<8x1xf32>
    %7 = tpu.reciprocal %6 {approx = true} : vector<8x1xf32> -> vector<8x1xf32>
    %c0_1 = arith.constant 0 : index
    %c0_2 = arith.constant 0 : index
    %c0_3 = arith.constant 0 : index
    %8 = vector.load %arg3[%c0_1, %c0_2, %c0_3] : memref<8x16x32xbf16, #tpu.memory_space<vmem>>, vector<8x16x32xbf16>
    %9 = vector.shape_cast %8 : vector<8x16x32xbf16> to vector<128x32xbf16>
    %c0_4 = arith.constant 0 : index
    %c0_5 = arith.constant 0 : index
    %10 = vector.load %arg4[%c0_4, %c0_5] : memref<32x16xbf16, #tpu.memory_space<vmem>>, vector<32x16xbf16>
    %cst_6 = arith.constant dense<0.000000e+00> : vector<128x16xf32>
    %11 = tpu.matmul %9, %10, %cst_6 {dimension_numbers = #tpu.dot_dimension_numbers<[1], [0], [0], [1], [0, 0, 1, 1], [], []>} : vector<128x32xbf16>, vector<32x16xbf16>, vector<128x16xf32> -> vector<128x16xf32>
    %c0_7 = arith.constant 0 : index
    %c0_8 = arith.constant 0 : index
    %12 = vector.load %arg5[%c0_7, %c0_8] : memref<1x16xf32, #tpu.memory_space<vmem>>, vector<1x16xf32>
    %13 = vector.broadcast %12 : vector<1x16xf32> to vector<128x16xf32>
    %14 = arith.addf %11, %13 : vector<128x16xf32>
    %15 = math.tanh %14 : vector<128x16xf32>
    %16 = vector.shape_cast %15 : vector<128x16xf32> to vector<8x16x16xf32>
    %17 = vector.shape_cast %4 : vector<8x16xf32> to vector<8x16x1xf32>
    %18 = vector.broadcast %17 : vector<8x16x1xf32> to vector<8x16x16xf32>
    %19 = arith.mulf %16, %18 : vector<8x16x16xf32>
    %cst_9 = arith.constant dense<0.000000e+00> : vector<8x16xf32>
    %20 = vector.multi_reduction <add>, %19, %cst_9 [1] : vector<8x16x16xf32> to vector<8x16xf32>
    %21 = vector.broadcast %7 : vector<8x1xf32> to vector<8x16xf32>
    %22 = arith.mulf %20, %21 : vector<8x16xf32>
    %23 = arith.truncf %22 : vector<8x16xf32> to vector<8x16xbf16>
    %c0_10 = arith.constant 0 : index
    %c0_11 = arith.constant 0 : index
    %24 = vector.load %arg6[%c0_10, %c0_11] : memref<16x32xbf16, #tpu.memory_space<vmem>>, vector<16x32xbf16>
    %cst_12 = arith.constant dense<0.000000e+00> : vector<8x32xf32>
    %25 = tpu.matmul %23, %24, %cst_12 {dimension_numbers = #tpu.dot_dimension_numbers<[1], [0], [0], [1], [0, 0, 1, 1], [], []>} : vector<8x16xbf16>, vector<16x32xbf16>, vector<8x32xf32> -> vector<8x32xf32>
    %c0_13 = arith.constant 0 : index
    %c0_14 = arith.constant 0 : index
    %26 = vector.load %arg7[%c0_13, %c0_14] : memref<1x32xf32, #tpu.memory_space<vmem>>, vector<1x32xf32>
    %27 = vector.broadcast %26 : vector<1x32xf32> to vector<8x32xf32>
    %28 = arith.addf %25, %27 : vector<8x32xf32>
    %29 = arith.negf %28 : vector<8x32xf32>
    %30 = math.exp %29 : vector<8x32xf32>
    %cst_15 = arith.constant 1.000000e+00 : f32
    %31 = vector.broadcast %cst_15 : f32 to vector<8x32xf32>
    %32 = arith.addf %31, %30 : vector<8x32xf32>
    %33 = arith.divf %31, %32 : vector<8x32xf32>
    %c0_16 = arith.constant 0 : index
    %c0_17 = arith.constant 0 : index
    %34 = vector.load %arg8[%c0_16, %c0_17] : memref<8x32xf32, #tpu.memory_space<vmem>>, vector<8x32xf32>
    tpu.vector_store %arg8[%c0_16, %c0_17], %33 {strides = array<i32>} : memref<8x32xf32, #tpu.memory_space<vmem>>, vector<8x32xf32>,
    %c0_18 = arith.constant 0 : index
    %c0_19 = arith.constant 0 : index
    %35 = vector.load %arg2[%c0_18, %c0_19] : memref<8x32xf32, #tpu.memory_space<vmem>>, vector<8x32xf32>
    %36 = arith.mulf %33, %35 : vector<8x32xf32>
    %c0_20 = arith.constant 0 : index
    %c0_21 = arith.constant 0 : index
    %37 = vector.load %arg9[%c0_20, %c0_21] : memref<8x32xf32, #tpu.memory_space<vmem>>, vector<8x32xf32>
    tpu.vector_store %arg9[%c0_20, %c0_21], %36 {strides = array<i32>} : memref<8x32xf32, #tpu.memory_space<vmem>>, vector<8x32xf32>,
    return
  }
  func.func @transform_0(%arg0: i32) -> (i32, i32) {
    %c0_i32 = arith.constant 0 : i32
    %c0_i32_0 = arith.constant 0 : i32
    return %arg0, %c0_i32 : i32, i32
  }
  func.func @transform_1(%arg0: i32) -> (i32, i32) {
    %c0_i32 = arith.constant 0 : i32
    %c0_i32_0 = arith.constant 0 : i32
    return %arg0, %c0_i32 : i32, i32
  }
  func.func @transform_2(%arg0: i32) -> (i32, i32, i32) {
    %c0_i32 = arith.constant 0 : i32
    %c0_i32_0 = arith.constant 0 : i32
    %c0_i32_1 = arith.constant 0 : i32
    return %arg0, %c0_i32, %c0_i32_0 : i32, i32, i32
  }
  func.func @transform_3(%arg0: i32) -> (i32, i32) {
    %c0_i32 = arith.constant 0 : i32
    %c0_i32_0 = arith.constant 0 : i32
    %c0_i32_1 = arith.constant 0 : i32
    return %c0_i32, %c0_i32_0 : i32, i32
  }
  func.func @transform_4(%arg0: i32) -> (i32, i32) {
    %c0_i32 = arith.constant 0 : i32
    %c0_i32_0 = arith.constant 0 : i32
    %c0_i32_1 = arith.constant 0 : i32
    return %c0_i32, %c0_i32_0 : i32, i32
  }
  func.func @transform_5(%arg0: i32) -> (i32, i32) {
    %c0_i32 = arith.constant 0 : i32
    %c0_i32_0 = arith.constant 0 : i32
    %c0_i32_1 = arith.constant 0 : i32
    return %c0_i32, %c0_i32_0 : i32, i32
  }
  func.func @transform_6(%arg0: i32) -> (i32, i32) {
    %c0_i32 = arith.constant 0 : i32
    %c0_i32_0 = arith.constant 0 : i32
    %c0_i32_1 = arith.constant 0 : i32
    return %c0_i32, %c0_i32_0 : i32, i32
  }
  func.func @transform_7(%arg0: i32) -> (i32, i32) {
    %c0_i32 = arith.constant 0 : i32
    %c0_i32_0 = arith.constant 0 : i32
    return %arg0, %c0_i32 : i32, i32
  }
  func.func @transform_8(%arg0: i32) -> (i32, i32) {
    %c0_i32 = arith.constant 0 : i32
    %c0_i32_0 = arith.constant 0 : i32
    return %arg0, %c0_i32 : i32, i32
  }
}

</mosaic_0001>

<bundles_post_ra>
// kernel: tpu_custom_call.1
= control target key start
LH: loop header
LB: loop body
LE: loop exit
PB: predicated region body
PF: predicated region fallthrough
CT: control target
= control target key end

     0   :  { %s1884_s0 = inlined_call_operand.vmem [shape: s32[16,16], index: 0, kind: input, shape index: {}]   ;;  %s1885_s1 = inlined_call_operand.hbm [shape: f32[16,32], index: 1, kind: input, shape index: {}]   ;;  %s1886_s2 = inlined_call_operand.hbm [shape: bf16[16,16,32], index: 2, kind: input, shape index: {}]   ;;  %s1887_s3 = inlined_call_operand.vmem [shape: bf16[32,16], index: 3, kind: input, shape index: {}]   ;;  %s1888_s4 = inlined_call_operand.vmem [shape: f32[1,16], index: 4, kind: input, shape index: {}]   ;;  %s1889_s5 = inlined_call_operand.vmem [shape: bf16[16,32], index: 5, kind: input, shape index: {}]   ;;  %s1890_s6 = inlined_call_operand.vmem [shape: f32[1,32], index: 6, kind: input, shape index: {}]   ;;  %s1891_s7 = inlined_call_operand.hbm [shape: f32[16,32], index: 7, kind: output, shape index: {0}]   ;;  %s1892_s8 = inlined_call_operand.hbm [shape: f32[16,32], index: 8, kind: output, shape index: {1}]  }
   0x1   :  { %1895 = sst [smem:[#allocation15_spill]] %s1885_s1 }
   0x2   :  { %14 = vsyncpa [#allocation3], 0 }
   0x3   :  { %16 = vsyncpa [#allocation3 + $0x1], 0 }
   0x4   :  { %17 = vsyncpa [#allocation6], 0 }
   0x5   :  { %19 = vsyncpa [#allocation6 + $0x1], 0 }
   0x6   :  { %20 = vsyncpa [#allocation4], 0 }
   0x7   :  { %22 = vsyncpa [#allocation4 + $0x1], 0 }
   0x8   :  { %23 = vsyncpa [#allocation9], 0 }
   0x9   :  { %25 = vsyncpa [#allocation9 + $0x1], 0  ;;  %s1516_s27 = smov 0   ;;  %s1518_s28 = smov 0  }
   0xa   :  { %s1520_s29 = smov 0   ;;  %s1522_s30 = smov 0  }
   0xb LB: > { %s1537_s9 = sadd.s32 4294967295, %s1461_s30   ;;  %s1101_s10 = sadd.s32 4294967294, %s1461_s30   ;;  %s1461_s30 = sphi %s1522_s30, %s1914_s30   ;;  %s1457_s29 = sphi %s1520_s29, %s1913_s29   ;;  %s1453_s28 = sphi %s1518_s28, %s1912_s28   ;;  %s1449_s27 = sphi %s1516_s27, %s1911_s27  }
   0xc   : > { %s1541_s11 = sadd.s32 1, %s1461_s30   ;;  %s64_s12 = sadd.s32 1, %s1457_s29 }
   0xd   : > { %s61_s13 = ssub.s32 %s1461_s30, %s1541_s11  ;;  %p71_p0 = scmp.ne.s32.totalorder %s1457_s29, %s1453_s28 }
   0xe   : > { %p62_p1 = scmp.eq.s32.totalorder %s61_s13, 0  ;;  %p72_p2 = scmp.eq.s32.totalorder %s1461_s30, 0 }
   0xf   : > { %p77_p3 = scmp.ne.s32.totalorder %s1453_s28, %s1449_s27  ;;  %p78_p4 = scmp.eq.s32.totalorder %s1537_s9, 0 }
  0x10   : > { %s1553_s14 = scalar_select %p62_p1, %s1457_s29, %s64_s12  }
  0x11   : > { %p1555_p5 = por %p72_p2, %p71_p0  ;;  %p1559_p6 = por %p78_p4, %p77_p3 }
  0x12   : > { %1896 = sst [smem:[#allocation14_spill]] %s1553_s14  ;;  %p211_p7 = scmp.eq.s32.totalorder %s1537_s9, 1 }
  0x13   : > { %s1898_s16 = scalar_select %p1559_p6, 1, 0 }
  0x14   : > { %p217_p8 = scmp.eq.s32.totalorder %s1101_s10, 1  ;;  %p1212_p10 = scmp.lt.s32.totalorder %s1461_s30, 2 }
  0x15   : > { %p1566_p11 = por %p211_p7, %p71_p0  ;;  %s1575_s19 = sand.u32 1, %s1457_s29  }
  0x16   : > { %p1570_p12 = por %p217_p8, %p77_p3  ;;  %s1105_s20 = sshll.u32 %s1461_s30, 7 }
  0x17   : > { %s1899_s17 = scalar_select %p1566_p11, 1, 0 }
  0x18   : > { %s1900_s18 = scalar_select %p1570_p12, 1, 0 }
  0x19   : > { %s1104_s21 = sshll.u32 %s1575_s19, 3  ;;  %s1901_s1 = sld [smem:[#allocation15_spill]] }
  0x1a   : > { %s286_s25 = scalar_lea.vmem [#allocation2], %s1104_s21  ;;  %p1586_p13 = pnand %p1212_p10, %p1555_p5 }
  0x1b   : > { %s293_s26 = sshll.u32 %s286_s25, 4  ;;  %s283_s12 = scalar_lea.sflag [#allocation3], %s1575_s19  ;;  %s1590_s26 = int_to_ptr.vmem [resolvable:$true] %s293_s26 }
  0x1c   : > { %p1301_p3 = pneg %p1586_p13 }
  0x1f   : > { %s1582_s24 = scalar_lea.hbm %s1901_s1, %s1105_s20  ;;  %s1304_s21 = scalar_lea.hbm %s1901_s1, 256 }
  0x20   : > { %s1299_s13 = scalar_lea.hbm %s1582_s24, 128  ;;  %p1305_p5 = scmp.lt.u32.totalorder %s1582_s24, %s1901_s1 }
  0x21   : > { %p1300_p2 = scmp.ne.s32.totalorder %s1582_s24, %s1299_s13  ;;  %p1306_p8 = scmp.lt.u32.totalorder %s1304_s21, %s1299_s13 }
  0x22   : > { %p1308_p9 = scmp.lt.u32.totalorder %s1299_s13, %s1582_s24 }
  0x23   : > { %p1302_p4 = pnand %p1301_p3, %p1300_p2  ;;  %p1307_p10 = por %p1306_p8, %p1305_p5 }
  0x25   : > { %p1303_p7 = pneg %p1302_p4  ;;  %p1309_p0 = por %p1308_p9, %p1307_p10 }
  0x27   : > { %p1310_p1 = pnand %p1309_p0, %p1303_p7 }
  0x29   : > { %1313 = shalt.err (!%p1310_p1)
}
  0x2a   : > { %s1314_s25 = scalar_lea.vmem %s1590_s26, 128  ;;  %s1463_s15 = smov [#allocation2]  }
  0x2b   : > { %p1315_p2 = scmp.ne.s32.totalorder %s1590_s26, %s1314_s25  ;;  %s1319_s20 = sshll.u32 %s1463_s15, 4  ;;  %s1320_s20 = int_to_ptr.vmem [resolvable:$false] %s1319_s20 }
  0x2c   : > { %s1321_s22 = scalar_lea.vmem %s1320_s20, 256  ;;  %p1322_p11 = scmp.lt.s32.totalorder %s1590_s26, %s1320_s20 }
  0x2d   : > { %p1317_p4 = pnand %p1315_p2, %p1301_p3  ;;  %p1323_p5 = scmp.lt.s32.totalorder %s1321_s22, %s1314_s25 }
  0x2f   : > { %p1318_p12 = pneg %p1317_p4  ;;  %p1324_p8 = por %p1323_p5, %p1322_p11 }
  0x31   : > { %p1325_p9 = pnand %p1324_p8, %p1318_p12 }
  0x33   : > { %1328 = shalt.err (!%p1325_p9)
}
  0x34   : > { %1201 = dma.hbm_to_vmem [thread:$0]  (!%p1586_p13), %s1582_s24, 128, %s1590_s26, %s283_s12  }
  0x35   : > { %p1903_p0 = scmp.lt.s32.totalorder %s1461_s30, 3  ;;  %p1904_p1 = scmp.ge.s32.totalorder %s1461_s30, 1 }
  0x36   : > { %s1106_s21 = sshll.u32 %s1575_s19, 6  ;;  %s1147_s23 = sshll.u32 %s1461_s30, 10 }
  0x37   : > { %p1624_p7 = pnand %p1904_p1, %p1903_p0  ;;  %s1633_s20 = scalar_lea.hbm %s1886_s2, %s1147_s23 }
  0x38   : > { %s304_s22 = scalar_lea.vmem [#allocation5], %s1106_s21  ;;  %s301_s24 = scalar_lea.sflag [#allocation6], %s1575_s19 }
  0x39   : > { %s312_s1 = sshll.u32 %s304_s22, 4  ;;  %s1329_s26 = scalar_lea.hbm %s1633_s20, 1024  ;;  %s1635_s1 = int_to_ptr.vmem [resolvable:$true] %s312_s1 }
  0x3a   : > { %p1330_p11 = scmp.ne.s32.totalorder %s1633_s20, %s1329_s26  ;;  %s1334_s23 = scalar_lea.hbm %s1886_s2, 2048 }
  0x3b   : > { %p1335_p2 = scmp.lt.u32.totalorder %s1633_s20, %s1886_s2  ;;  %p1336_p4 = scmp.lt.u32.totalorder %s1334_s23, %s1329_s26 }
  0x3c   : > { %p1332_p12 = pnand %p1330_p11, %p1301_p3  ;;  %p1338_p8 = scmp.lt.u32.totalorder %s1329_s26, %s1633_s20 }
  0x3d   : > { %p1337_p5 = por %p1336_p4, %p1335_p2 }
  0x3e   : > { %p1333_p10 = pneg %p1332_p12 }
  0x3f   : > { %p1339_p9 = por %p1338_p8, %p1337_p5 }
  0x41   : > { %p1340_p0 = pnand %p1339_p9, %p1333_p10 }
  0x43   : > { %1343 = shalt.err (!%p1340_p0)
}
  0x44   : > { %s1344_s21 = scalar_lea.vmem %s1635_s1, 1024  ;;  %s1464_s14 = smov [#allocation5]  }
  0x45   : > { %p1345_p1 = scmp.ne.s32.totalorder %s1635_s1, %s1344_s21  ;;  %s1349_s22 = sshll.u32 %s1464_s14, 4  ;;  %s1350_s22 = int_to_ptr.vmem [resolvable:$false] %s1349_s22 }
  0x46   : > { %s1351_s12 = scalar_lea.vmem %s1350_s22, 2048  ;;  %p1352_p6 = scmp.lt.s32.totalorder %s1635_s1, %s1350_s22 }
  0x47   : > { %p1347_p11 = pnand %p1345_p1, %p1301_p3  ;;  %p1353_p2 = scmp.lt.s32.totalorder %s1351_s12, %s1344_s21 }
  0x49   : > { %p1348_p12 = pneg %p1347_p11  ;;  %p1354_p4 = por %p1353_p2, %p1352_p6 }
  0x4b   : > { %p1355_p5 = pnand %p1354_p4, %p1348_p12 }
  0x4d   : > { %1358 = shalt.err (!%p1355_p5)
}
  0x4e   : > { %s1465_s26 = smov 64   ;;  %s1466_s23 = smov 4  }
  0x4f   : > { %1204 = dma.hbm_to_vmem [thread:$0]  (!%p1586_p13), %s1633_s20, 1024, %s1635_s1, %s301_s24, %s1465_s26, %s1465_s26, %s1466_s23  }
  0x50   : > { %324 = sbr.rel (%p1624_p7) target bundleno = 654 (0x28e), region = 48  ;;  %s1666_s25 = sand.u32 (!%p1624_p7), 1, %s1453_s28  }
  0x51   : > { %s1669_s15 = sshll.u32 (!%p1624_p7), %s1666_s25, 3  ;;  %s327_s21 = scalar_lea.sflag (!%p1624_p7), [#allocation3], %s1666_s25 }
  0x52   : > { %s330_s14 = scalar_lea.vmem (!%p1624_p7), [#allocation2], %s1669_s15  ;;  %p1906_p6 = scmp.ne.s32.totalorder (!%p1624_p7), %s1898_s16, 0 }
  0x57   : > { %1432 = dma.done.wait (%p1906_p6), %s327_s21, 128  }
  0x58   : > { %1434 = vsyncadd (%p1906_p6), %s327_s21, 4294967168  ;;  %s1112_s1 = sshll.u32 %s1666_s25, 6  ;;  %s336_s19 = scalar_lea.sflag [#allocation6], %s1666_s25 }
  0x59   : > { %s1679_s10 = scalar_lea.vmem [#allocation5], %s1112_s1 }
  0x5a   : > { %1436 = dma.done.wait (%p1906_p6), %s336_s19, 1024  }
  0x5b   : > { %1438 = vsyncadd (%p1906_p6), %s336_s19, 4294966272  ;;  %p386_p13 = scmp.lt.s32.totalorder %s1537_s9, 1  ;;  %v1250_v0 = vld [vmem:[%s1887_s3] sm:$0xff]   ;;  %v1251_v1 = vld [vmem:[%s1887_s3 + $0x8] sm:$0xff]   ;;  %v618_v2 = vlaneseq  ;;  %vm480_vm0 = vcmask 261120   ;;  %v1467_v9 = vmov 0.0  }
  0x5c   : > { %1160 = vmatprep.subr.bf16.mxu0 %v1250_v0  ;;  %1186 = vmatprep.subr.bf16.mxu1 %v1250_v0  ;;  %v1252_v3 = vld [vmem:[%s1679_s10] sm:$0xff]   ;;  %v1253_v4 = vld [vmem:[%s1679_s10 + $0x30] sm:$0xff]   ;;  %v1254_v5 = vld [vmem:[%s1679_s10 + $0x8] sm:$0xff]   ;;  %vm396_vm1 = vcmask 130048   ;;  %vm1468_vm3 = vmmov 0   ;;  %vm852_vm4 = vcmask 1041409  }
  0x5d   : > { %s387_s24 = scalar_select %p386_p13, %s1537_s9, 1  ;;  %1161 = vmatpush3.bf16.msra.mxu0 %v1250_v0  ;;  %1188 = vmatpush3.bf16.msra.mxu1 %v1250_v0  ;;  %v619_v6 = vshrl.u32 %v618_v2, 7  ;;  %v1255_v7 = vld [vmem:[%s1679_s10 + $0x38] sm:$0xff]   ;;  %v1256_v8 = vld [vmem:[%s1679_s10 + $0x10] sm:$0xff]   ;;  %v1258_v17 = vld [vmem:[%s1679_s10 + $0x20] sm:$0xff]   ;;  %vm855_vm5 = vcmask 1042434  }
  0x5e   : > { %1162 = vmatprep.subr.bf16.mxu0 %v1251_v1  ;;  %1187 = vmatprep.subr.bf16.mxu1 %v1251_v1  ;;  %v1257_v16 = vld [vmem:[%s1679_s10 + $0x18] sm:$0xff]   ;;  %v1259_v20 = vld [vmem:[%s1679_s10 + $0x28] sm:$0xff]   ;;  %v1260_v32 = vld [vmem:[%s1889_s5] sm:$0xff]   ;;  %vm858_vm6 = vcmask 1043459   ;;  %vm861_vm7 = vcmask 1044484   ;;  %vm864_vm8 = vcmask 1045509  }
  0x5f   : > { %s1115_s16 = sshll.u32 %s387_s24, 3  ;;  %1164 = vmatprep.mubr.msk.bf16.mxu0 %vm480_vm0, %v1252_v3  ;;  %1176 = vmatprep.mubr.msk.bf16.mxu1 %vm480_vm0, %v1253_v4  ;;  %v631_v10 = vsub.s32 1, %v619_v6  ;;  %v642_v12 = vsub.s32 2, %v619_v6  ;;  %v620_v19 = vsub.s32 0, %v619_v6  ;;  %v653_v22 = vsub.s32 3, %v619_v6  ;;  %s1142_s22 = sshll.u32 %s1537_s9, 7 }
  0x60   : > { %s389_s21 = scalar_lea.vmem %s1884_s0, %s1115_s16  ;;  %v664_v24 = vsub.s32 4, %v619_v6  ;;  %v675_v26 = vsub.s32 5, %v619_v6  ;;  %v686_v28 = vsub.s32 6, %v619_v6  ;;  %v697_v30 = vsub.s32 7, %v619_v6  ;;  %v1733_v43 = vld [vmem:[%s1888_s4] ss:$0 sm:$0xff]  ;;  %s1807_s19 = scalar_lea.hbm %s1891_s7, %s1142_s22 }
  0x61   : > { %1163 = vmatpush3.bf16.msra.mxu0 %v1251_v1  ;;  %1189 = vmatpush3.bf16.msra.mxu1 %v1251_v1  ;;  %v392_v11 = vld [vmem:[%s389_s21] sm:$0xff]  ;;  %vm867_vm9 = vcmask 1046534   ;;  %vm870_vm10 = vcmask 1047559   ;;  %s378_s12 = scalar_lea.vmem [#allocation7], %s1669_s15  ;;  %s385_s26 = scalar_lea.vmem [#allocation8], %s1669_s15 }
  0x62   : > { %1180 = vmatprep.subr.bf16.mxu1 %v1467_v9  ;;  %vm393_vm2 = vcmp.ne.s32.totalorder %v392_v11, 0  ;;  %s951_s16 = sshll.u32 %s378_s12, 4  ;;  %s964_s23 = sshll.u32 %s385_s26, 4  ;;  %s1809_s16 = int_to_ptr.vmem [resolvable:$true] %s951_s16  ;;  %s1817_s23 = int_to_ptr.vmem [resolvable:$true] %s964_s23 }
  0x63   : > { %v1116_v13 = vsel %vm393_vm2, 1.0, %v1467_v9  ;;  %s933_s13 = scalar_lea.sflag [#allocation4], %s1666_s25  ;;  %s1359_s20 = scalar_lea.vmem %s1809_s16, 128 }
  0x64   : > { %1165 = vmatmul.mubr.msk.bf16.vlgmr.msra.gmra.mrb[0].mxu0 %vm480_vm0, %v1254_v5  ;;  %1177 = vmatmul.mubr.msk.bf16.vlgmr.msra.gmra.mrb[0].mxu1 %vm480_vm0, %v1255_v7  ;;  %v397_v14 = vsel %vm396_vm1, %v1116_v13, 0.0  ;;  %v632_v15 = vrot.slane %v1116_v13, %v631_v10  ;;  %v643_v18 = vrot.slane %v1116_v13, %v642_v12  ;;  %v621_v21 = vrot.slane %v1116_v13, %v620_v19  ;;  %p1360_p3 = scmp.ne.s32.totalorder %s1809_s16, %s1359_s20  ;;  %p1907_p7 = scmp.ne.s32.totalorder %s1899_s17, 0 }
  0x65   : > { %1168 = vmatprep.mubr.msk.bf16.mxu0 %vm480_vm0, %v1256_v8  ;;  %398 = vadd.xlane.f32.xlu0 %v397_v14  ;;  %v654_v23 = vrot.slane %v1116_v13, %v653_v22  ;;  %v665_v25 = vrot.slane %v1116_v13, %v664_v24  ;;  %v676_v27 = vrot.slane %v1116_v13, %v675_v26  ;;  %s1469_s24 = smov [#allocation7]  }
  0x66   : > { %638 = vbcast.lane.b32.xlu1 %v632_v15, 264  ;;  %v687_v29 = vrot.slane %v1116_v13, %v686_v28  ;;  %v698_v31 = vrot.slane %v1116_v13, %v697_v30  ;;  %1182 = vmatprep.mubr.msk.bf16.mxu1 %vm1468_vm3, %v1467_v9  ;;  %p1361_p10 = pnand %p1360_p3, %p1907_p7  ;;  %s1363_s21 = sshll.u32 %s1469_s24, 4  ;;  %s1364_s21 = int_to_ptr.vmem [resolvable:$false] %s1363_s21 }
  0x67   : > { %1181 = vmatpush3.bf16.msra.mxu1 %v1260_v32  ;;  %s1365_s1 = scalar_lea.vmem %s1364_s21, 256  ;;  %p1366_p9 = scmp.lt.s32.totalorder %s1809_s16, %s1364_s21 }
  0x68   : > { %p1362_p8 = pneg %p1361_p10  ;;  %p1367_p0 = scmp.lt.s32.totalorder %s1365_s1, %s1359_s20 }
  0x6a   : > { %645 = vbcast.lane.b32.xlu1 %v643_v18, 256  ;;  %p1368_p1 = por %p1367_p0, %p1366_p9 }
  0x6c   : > { %1169 = vmatmul.mubr.msk.bf16.gmra.mrb[4].mxu0 %vm480_vm0, %v1257_v16  ;;  %p1369_p11 = pnand %p1368_p1, %p1362_p8 }
  0x6d   : > { %1172 = vmatprep.mubr.msk.bf16.mxu0 %vm480_vm0, %v1258_v17 }
  0x6e   : > { %649 = vbcast.lane.b32.xlu1 %v643_v18, 264 }
  0x72   : > { %623 = vbcast.lane.b32.xlu1 %v621_v21, 256 }
  0x74   : > { %1173 = vmatmul.mubr.msk.bf16.gmra.mrb[8].mxu0 %vm480_vm0, %v1259_v20 }
  0x76   : > { %627 = vbcast.lane.b32.xlu1 %v621_v21, 264 }
  0x7a   : > { %656 = vbcast.lane.b32.xlu1 %v654_v23, 256 }
  0x7b   : > { %634 = vbcast.lane.b32.xlu0 %v632_v15, 256 }
  0x7e   : > { %660 = vbcast.lane.b32.xlu1 %v654_v23, 264 }
  0x7f   : > { %667 = vbcast.lane.b32.xlu0 %v665_v25, 256 }
  0x82   : > { %671 = vbcast.lane.b32.xlu1 %v665_v25, 264 }
  0x83   : > { %678 = vbcast.lane.b32.xlu0 %v676_v27, 256 }
  0x86   : > { %682 = vbcast.lane.b32.xlu1 %v676_v27, 264 }
  0x87   : > { %689 = vbcast.lane.b32.xlu0 %v687_v29, 256 }
  0x8a   : > { %693 = vbcast.lane.b32.xlu1 %v687_v29, 264 }
  0x8b   : > { %700 = vbcast.lane.b32.xlu0 %v698_v31, 256 }
  0x8e   : > { %704 = vbcast.lane.b32.xlu1 %v698_v31, 264 }
  0xd8   : > { %v1716_v33 = vpop.permute.xlu1 %638 }
  0xdc   : > { %v1718_v34 = vpop.permute.xlu1 %645 }
  0xe0   : > { %v1720_v35 = vpop.permute.xlu1 %649 }
  0xe4   : > { %v624_v36 = vpop.permute.xlu1 %623 }
  0xe8   : > { %v1722_v37 = vpop.permute.xlu1 %627 }
  0xec   : > { %v1724_v39 = vpop.permute.xlu1 %656 }
  0xf0   : > { %v1726_v41 = vpop.permute.xlu1 %660 }
  0xf2   : > { %v399_v38 = vpop.xlane.xlu0 %398 }
  0xf4   : > { %v1735_v44 = vpop.permute.xlu1 %671 }
  0xf6   : > { %v635_v40 = vpop.permute.xlu0 %634 }
  0xf8   : > { %v1745_v60 = vpop.permute.xlu1 %682 }
  0xfa   : > { %v1728_v42 = vpop.permute.xlu0 %667 }
  0xfc   : > { %v694_v5 = vpop.permute.xlu1 %693 }
  0xfe   : > { %v1737_v45 = vpop.permute.xlu0 %678 }
 0x100   : > { %v705_v17 = vpop.permute.xlu1 %704 }
 0x102   : > { %v690_v63 = vpop.permute.xlu0 %689 }
 0x106   : > { %v701_v9 = vpop.permute.xlu0 %700 }
 0x137   : > { %v1166_v46 = vpop.f32.mrb[0].mxu0  ;;  %v1178_v47 = vpop.f32.mrb[0].mxu1 }
 0x138   : > { %v548_v48 = vadd.f32 %v1166_v46, %v1733_v43  ;;  %v596_v49 = vadd.f32 %v1178_v47, %v1733_v43  ;;  %v539_v50 = vpop.f32.mrb[1].mxu0  ;;  %v587_v51 = vpop.f32.mrb[1].mxu1 }
 0x139   : > { %v540_v52 = vadd.f32 %v1733_v43, %v539_v50  ;;  %v588_v53 = vadd.f32 %v1733_v43, %v587_v51  ;;  %v1167_v54 = vpop.f32.mrb[2].mxu0  ;;  %v1179_v55 = vpop.f32.mrb[2].mxu1 }
 0x13a   : > { %1261 = vtanh.f32 %v548_v48  ;;  %v551_v56 = vadd.f32 %v1167_v54, %v1733_v43  ;;  %v542_v57 = vpop.f32.mrb[3].mxu0  ;;  %v590_v58 = vpop.f32.mrb[3].mxu1  ;;  %v599_v59 = vadd.f32 %v1179_v55, %v1733_v43 }
 0x13b   : > { %1263 = vtanh.f32 %v596_v49  ;;  %v543_v61 = vadd.f32 %v1733_v43, %v542_v57  ;;  %v591_v62 = vadd.f32 %v1733_v43, %v590_v58 }
 0x13c   : > { %1265 = vtanh.f32 %v540_v52 }
 0x13d   : > { %1267 = vtanh.f32 %v588_v53 }
 0x13e   : > { %1269 = vtanh.f32 %v551_v56 }
 0x13f   : > { %1271 = vtanh.f32 %v599_v59  ;;  %v1170_v0 = vpop.f32.mrb[4].mxu0 }
 0x140   : > { %1273 = vtanh.f32 %v543_v61  ;;  %v564_v1 = vadd.f32 %v1170_v0, %v1733_v43  ;;  %v555_v2 = vpop.f32.mrb[5].mxu0 }
 0x141   : > { %1275 = vtanh.f32 %v591_v62  ;;  %v556_v3 = vadd.f32 %v1733_v43, %v555_v2  ;;  %v1171_v4 = vpop.f32.mrb[6].mxu0 }
 0x142   : > { %1277 = vtanh.f32 %v564_v1  ;;  %v567_v6 = vadd.f32 %v1171_v4, %v1733_v43  ;;  %v558_v7 = vpop.f32.mrb[7].mxu0 }
 0x143   : > { %1279 = vtanh.f32 %v556_v3  ;;  %v559_v8 = vadd.f32 %v1733_v43, %v558_v7 }
 0x144   : > { %v1262_v10 = vpop.eup %1261  ;;  %1281 = vtanh.f32 %v567_v6 }
 0x145   : > { %v1264_v11 = vpop.eup %1263  ;;  %v708_v12 = vmul.f32 %v1262_v10, %v635_v40  ;;  %1283 = vtanh.f32 %v559_v8 }
 0x146   : > { %v1266_v13 = vpop.eup %1265  ;;  %v720_v14 = vmul.f32 %v1264_v11, %v701_v9  ;;  %1285 = vrcp.f32 %v399_v38 }
 0x147   : > { %v1268_v15 = vpop.eup %1267  ;;  %v706_v16 = vmul.f32 %v1266_v13, %v624_v36  ;;  %v1174_v18 = vpop.f32.mrb[8].mxu0  ;;  %v731_v20 = vsel %vm396_vm1, %v708_v12, 0.0 }
 0x148   : > { %v1270_v19 = vpop.eup %1269  ;;  %v718_v21 = vmul.f32 %v1268_v15, %v690_v63  ;;  %v580_v22 = vadd.f32 %v1174_v18, %v1733_v43  ;;  %v571_v23 = vpop.f32.mrb[9].mxu0  ;;  %v785_v27 = vsel %vm396_vm1, %v720_v14, 0.0 }
 0x149   : > { %v1272_v24 = vpop.eup %1271  ;;  %v722_v25 = vsel %vm396_vm1, %v706_v16, 0.0  ;;  %v709_v26 = vmul.f32 %v1270_v19, %v1716_v33  ;;  %v572_v28 = vadd.f32 %v1733_v43, %v571_v23  ;;  %v1175_v29 = vpop.f32.mrb[10].mxu0 }
 0x14a   : > { %v1274_v30 = vpop.eup %1273  ;;  %v776_v31 = vsel %vm396_vm1, %v718_v21, 0.0  ;;  %v721_v32 = vmul.f32 %v1272_v24, %v705_v17  ;;  %1287 = vtanh.f32 %v580_v22  ;;  %v583_v36 = vadd.f32 %v1175_v29, %v1733_v43  ;;  %v574_v38 = vpop.f32.mrb[11].mxu0 }
 0x14b   : > { %v1276_v40 = vpop.eup %1275  ;;  %v732_v46 = vsel %vm396_vm1, %v709_v26, 0.0  ;;  %v707_v47 = vmul.f32 %v1274_v30, %v1722_v37  ;;  %1289 = vtanh.f32 %v572_v28  ;;  %v575_v33 = vadd.f32 %v1733_v43, %v574_v38 }
 0x14c   : > { %v1278_v48 = vpop.eup %1277  ;;  %v733_v49 = vadd.f32 %v732_v46, %v731_v20  ;;  %v719_v50 = vmul.f32 %v1276_v40, %v694_v5  ;;  %v786_v51 = vsel %vm396_vm1, %v721_v32, 0.0  ;;  %1291 = vtanh.f32 %v583_v36 }
 0x14d   : > { %v1280_v52 = vpop.eup %1279  ;;  %v723_v53 = vsel %vm396_vm1, %v707_v47, 0.0  ;;  %v712_v54 = vmul.f32 %v1278_v48, %v1724_v39  ;;  %v787_v55 = vadd.f32 %v786_v51, %v785_v27  ;;  %1293 = vtanh.f32 %v575_v33 }
 0x14e   : > { %v1282_v56 = vpop.eup %1281  ;;  %v734_v57 = vrot.slane %v733_v49, 4  ;;  %v724_v58 = vadd.f32 %v723_v53, %v722_v25  ;;  %v710_v37 = vmul.f32 %v1280_v52, %v1718_v34  ;;  %v777_v43 = vsel %vm396_vm1, %v719_v50, 0.0 }
 0x14f   : > { %v1284_v59 = vpop.eup %1283  ;;  %v713_v61 = vmul.f32 %v1282_v56, %v1726_v41  ;;  %v778_v62 = vadd.f32 %v777_v43, %v776_v31  ;;  %v788_v63 = vrot.slane %v787_v55, 4  ;;  %v749_v39 = vsel %vm396_vm1, %v712_v54, 0.0 }
 0x150   : > { %v735_v0 = vadd.f32 %v734_v57, %v733_v49  ;;  %v725_v1 = vrot.slane %v724_v58, 4  ;;  %v711_v2 = vmul.f32 %v1284_v59, %v1720_v35  ;;  %v740_v3 = vsel %vm396_vm1, %v710_v37, 0.0  ;;  %v1774_v6 = vpop.eup %1285 }
 0x151   : > { %v750_v4 = vsel %vm396_vm1, %v713_v61, 0.0  ;;  %v779_v5 = vrot.slane %v778_v62, 4  ;;  %v789_v10 = vadd.f32 %v788_v63, %v787_v55  ;;  %v795_v22 = vrot.slane %v1774_v6, 1 }
 0x152   : > { %v736_v34 = vrot.slane %v735_v0, 2  ;;  %v726_v7 = vadd.f32 %v725_v1, %v724_v58  ;;  %v751_v8 = vadd.f32 %v750_v4, %v749_v39  ;;  %v741_v41 = vsel %vm396_vm1, %v711_v2, 0.0 }
 0x153   : > { %v742_v9 = vadd.f32 %v741_v41, %v740_v3  ;;  %v780_v16 = vadd.f32 %v779_v5, %v778_v62  ;;  %v790_v24 = vrot.slane %v789_v10, 2  ;;  %v797_v29 = vrot.slane %v1774_v6, 3 }
 0x154   : > { %v1288_v11 = vpop.eup %1287  ;;  %v737_v12 = vadd.f32 %v736_v34, %v735_v0  ;;  %v727_v13 = vrot.slane %v726_v7, 2  ;;  %v752_v35 = vrot.slane %v751_v8, 4  ;;  %v796_v43 = vrot.slane %v1774_v6, 2 }
 0x155   : > { %v1290_v14 = vpop.eup %1289  ;;  %v743_v15 = vrot.slane %v742_v9, 4  ;;  %v716_v25 = vmul.f32 %v1288_v11, %v1737_v45  ;;  %v781_v31 = vrot.slane %v780_v16, 2  ;;  %v791_v48 = vadd.f32 %v790_v24, %v789_v10 }
 0x156   : > { %v1292_v17 = vpop.eup %1291  ;;  %v738_v18 = vrot.slane %v737_v12, 1  ;;  %v728_v19 = vadd.f32 %v727_v13, %v726_v7  ;;  %v753_v20 = vadd.f32 %v752_v35, %v751_v8  ;;  %v714_v32 = vmul.f32 %v1290_v14, %v1728_v42 }
 0x157   : > { %v1294_v21 = vpop.eup %1293  ;;  %v744_v23 = vadd.f32 %v743_v15, %v742_v9  ;;  %v717_v36 = vmul.f32 %v1292_v17, %v1745_v60  ;;  %v767_v45 = vsel %vm396_vm1, %v716_v25, 0.0  ;;  %v782_v42 = vadd.f32 %v781_v31, %v780_v16 }
 0x158   : > { %v739_v26 = vadd.f32 %v738_v18, %v737_v12  ;;  %v729_v27 = vrot.slane %v728_v19, 1  ;;  %v754_v28 = vrot.slane %v753_v20, 2  ;;  %v715_v47 = vmul.f32 %v1294_v21, %v1735_v44 }
 0x159   : > { %v745_v30 = vrot.slane %v744_v23, 2  ;;  %v768_v49 = vsel %vm396_vm1, %v717_v36, 0.0  ;;  %v758_v60 = vsel %vm396_vm1, %v714_v32, 0.0  ;;  %v783_v2 = vrot.slane %v782_v42, 1 }
 0x15a   : > { %v811_v38 = vmul.f32 %v795_v22, %v739_v26  ;;  %v730_v40 = vadd.f32 %v729_v27, %v728_v19  ;;  %v755_v46 = vadd.f32 %v754_v28, %v753_v20  ;;  %v769_v53 = vadd.f32 %v768_v49, %v767_v45 }
 0x15b   : > { %v746_v33 = vadd.f32 %v745_v30, %v744_v23  ;;  %v759_v55 = vsel %vm396_vm1, %v715_v47, 0.0  ;;  %v792_v4 = vrot.slane %v791_v48, 1  ;;  %v784_v11 = vadd.f32 %v783_v2, %v782_v42 }
 0x15c   : > { %v819_v50 = vpack.c.bf16 %v811_v38, %v811_v38  ;;  %v810_v51 = vmul.f32 %v1774_v6, %v730_v40  ;;  %v756_v52 = vrot.slane %v755_v46, 1  ;;  %v770_v58 = vrot.slane %v769_v53, 4 }
 0x15d   : > { %v747_v54 = vrot.slane %v746_v33, 1  ;;  %v760_v59 = vadd.f32 %v759_v55, %v758_v60  ;;  %v793_v13 = vadd.f32 %v792_v4, %v791_v48  ;;  %v800_v15 = vrot.slane %v1774_v6, 6 }
 0x15e   : > { %v844_v56 = vunpack.c.l.b16 %v819_v50  ;;  %v818_v57 = vpack.c.bf16 %v810_v51, %v810_v51  ;;  %v757_v44 = vadd.f32 %v756_v52, %v755_v46  ;;  %v771_v0 = vadd.f32 %v770_v58, %v769_v53 }
 0x15f   : > { %v748_v37 = vadd.f32 %v747_v54, %v746_v33  ;;  %v761_v39 = vrot.slane %v760_v59, 4  ;;  %v801_v18 = vrot.slane %v1774_v6, 7  ;;  %v799_v20 = vrot.slane %v1774_v6, 5  ;;  %v1136_v54 = vld [vmem:[%s1890_s6] ss:$0 sm:$0xff] }
 0x160   : > { %v851_v61 = vrot.slane %v844_v56, 7  ;;  %v843_v62 = vunpack.c.l.b16 %v818_v57  ;;  %v813_v63 = vmul.f32 %v797_v29, %v757_v44  ;;  %v772_v5 = vrot.slane %v771_v0, 2 }
 0x161   : > { %v812_v1 = vmul.f32 %v796_v43, %v748_v37  ;;  %v762_v8 = vadd.f32 %v761_v39, %v760_v59  ;;  %v816_v21 = vmul.f32 %v800_v15, %v784_v11  ;;  %v817_v24 = vmul.f32 %v801_v18, %v793_v13  ;;  %v929_v43 = vld [vmem:[%s330_s14] sm:$0xff]  ;;  %s1815_s14 = scalar_lea.hbm %s1892_s8, %s1142_s22 }
 0x162   : > { %v821_v3 = vpack.c.bf16 %v813_v63, %v813_v63  ;;  %v853_v34 = vsel %vm852_vm4, %v851_v61, %v843_v62  ;;  %v773_v9 = vadd.f32 %v772_v5, %v771_v0  ;;  %v798_v28 = vrot.slane %v1774_v6, 4 }
 0x163   : > { %v820_v7 = vpack.c.bf16 %v812_v1, %v812_v1  ;;  %v763_v12 = vrot.slane %v762_v8, 2  ;;  %v824_v30 = vpack.c.bf16 %v816_v21, %v816_v21  ;;  %v825_v32 = vpack.c.bf16 %v817_v24, %v817_v24 }
 0x164   : > { %v846_v41 = vunpack.c.l.b16 %v821_v3  ;;  %v774_v35 = vrot.slane %v773_v9, 1 }
 0x165   : > { %v845_v10 = vunpack.c.l.b16 %v820_v7  ;;  %v764_v16 = vadd.f32 %v763_v12, %v762_v8  ;;  %v849_v40 = vunpack.c.l.b16 %v824_v30  ;;  %v850_v47 = vunpack.c.l.b16 %v825_v32 }
 0x166   : > { %v857_v17 = vrot.slane %v846_v41, 5  ;;  %v775_v19 = vadd.f32 %v774_v35, %v773_v9 }
 0x167   : > { %v854_v14 = vrot.slane %v845_v10, 6  ;;  %v765_v22 = vrot.slane %v764_v16, 1  ;;  %v866_v45 = vrot.slane %v849_v40, 2  ;;  %v869_v50 = vrot.slane %v850_v47, 1 }
 0x168   : > { %v815_v25 = vmul.f32 %v799_v20, %v775_v19 }
 0x169   : > { %v856_v23 = vsel %vm855_vm5, %v854_v14, %v853_v34  ;;  %v766_v27 = vadd.f32 %v765_v22, %v764_v16 }
 0x16a   : > { %v859_v26 = vsel %vm858_vm6, %v857_v17, %v856_v23  ;;  %v823_v29 = vpack.c.bf16 %v815_v25, %v815_v25 }
 0x16b   : > { %v814_v31 = vmul.f32 %v798_v28, %v766_v27 }
 0x16c   : > { %v848_v38 = vunpack.c.l.b16 %v823_v29 }
 0x16d   : > { %v822_v36 = vpack.c.bf16 %v814_v31, %v814_v31 }
 0x16e   : > { %v863_v48 = vrot.slane %v848_v38, 3 }
 0x16f   : > { %v847_v46 = vunpack.c.l.b16 %v822_v36 }
 0x171   : > { %v860_v33 = vrot.slane %v847_v46, 4 }
 0x173   : > { %v862_v49 = vsel %vm861_vm7, %v860_v33, %v859_v26 }
 0x174   : > { %v865_v51 = vsel %vm864_vm8, %v863_v48, %v862_v49 }
 0x175   : > { %v868_v6 = vsel %vm867_vm9, %v866_v45, %v865_v51 }
 0x176   : > { %v871_v52 = vsel %vm870_vm10, %v869_v50, %v868_v6 }
 0x177   : > { %v872_v53 = vpack.c.b16 %v871_v52, %v871_v52 }
 0x179   : > { %1183 = vmatmul.mubr.msk.bf16.vlgmr.msra.gmra.mrb[4].mxu1 %vm396_vm1, %v872_v53 }
 0x24c   : > { %v916_v42 = vpop.f32.mrb[4].mxu1 }
 0x24d   : > { %v917_v60 = vadd.f32 %v1136_v54, %v916_v42  ;;  %v1184_v55 = vpop.f32.mrb[5].mxu1 }
 0x24e   : > { %v919_v56 = vpop.f32.mrb[6].mxu1 }
 0x24f   : > { %v1139_v57 = vmul.f32 -1.442695, %v917_v60  ;;  %v1185_v44 = vpop.f32.mrb[7].mxu1 }
 0x251   : > { %1295 = vpow2.f32 %v1139_v57 }
 0x25b   : > { %v1296_v58 = vpop.eup %1295 }
 0x25c   : > { %v925_v37 = vadd.f32 1.0, %v1296_v58 }
 0x25e   : > { %1297 = vrcp.f32 %v925_v37 }
 0x268   : > { %v1298_v59 = vpop.eup %1297 }
 0x269   : > { %928 = vst.msk [vmem:[%s378_s12] sm:$0xff] %vm480_vm0, %v1298_v59  ;;  %v930_v61 = vmul.f32 %v1298_v59, %v929_v43 }
 0x26a   : > { %1372 = shalt.err (!%p1369_p11)
}
 0x26b   : > { %s1373_s22 = scalar_lea.hbm %s1807_s19, 128  ;;  %s1377_s10 = scalar_lea.hbm %s1891_s7, 256 }
 0x26c   : > { %p1374_p12 = scmp.ne.s32.totalorder %s1807_s19, %s1373_s22  ;;  %p1378_p5 = scmp.lt.u32.totalorder %s1807_s19, %s1891_s7 }
 0x26d   : > { %p1379_p6 = scmp.lt.u32.totalorder %s1377_s10, %s1373_s22  ;;  %p1381_p3 = scmp.lt.u32.totalorder %s1373_s22, %s1807_s19 }
 0x26e   : > { %p1375_p2 = pnand %p1374_p12, %p1907_p7 }
 0x26f   : > { %p1380_p13 = por %p1379_p6, %p1378_p5 }
 0x270   : > { %p1376_p4 = pneg %p1375_p2 }
 0x271   : > { %p1382_p10 = por %p1381_p3, %p1380_p13 }
 0x273   : > { %p1383_p8 = pnand %p1382_p10, %p1376_p4 }
 0x275   : > { %1386 = shalt.err (!%p1383_p8)
}
 0x276   : > { %1194 = dma.vmem_to_hbm [thread:$0]  (%p1907_p7), %s1809_s16, 128, %s1807_s19, %s933_s13   ;;  %931 = vst.msk [vmem:[%s385_s26] sm:$0xff] %vm480_vm0, %v930_v61 }
 0x277   : > { %s938_s20 = scalar_lea.sflag [#allocation9], %s1666_s25  ;;  %s1387_s1 = scalar_lea.vmem %s1817_s23, 128 }
 0x278   : > { %p1388_p9 = scmp.ne.s32.totalorder %s1817_s23, %s1387_s1  ;;  %s1470_s22 = smov [#allocation8]  }
 0x279   : > { %s1391_s12 = sshll.u32 %s1470_s22, 4  ;;  %s1392_s12 = int_to_ptr.vmem [resolvable:$false] %s1391_s12 }
 0x27a   : > { %p1389_p0 = pnand %p1388_p9, %p1907_p7  ;;  %s1393_s9 = scalar_lea.vmem %s1392_s12, 256 }
 0x27b   : > { %p1394_p11 = scmp.lt.s32.totalorder %s1817_s23, %s1392_s12  ;;  %p1395_p12 = scmp.lt.s32.totalorder %s1393_s9, %s1387_s1 }
 0x27c   : > { %p1390_p1 = pneg %p1389_p0 }
 0x27d   : > { %p1396_p2 = por %p1395_p12, %p1394_p11 }
 0x27f   : > { %p1397_p4 = pnand %p1396_p2, %p1390_p1 }
 0x281   : > { %1400 = shalt.err (!%p1397_p4)
}
 0x282   : > { %s1401_s25 = scalar_lea.hbm %s1815_s14, 128  ;;  %s1405_s26 = scalar_lea.hbm %s1892_s8, 256 }
 0x283   : > { %p1402_p5 = scmp.ne.s32.totalorder %s1815_s14, %s1401_s25  ;;  %p1406_p3 = scmp.lt.u32.totalorder %s1815_s14, %s1892_s8 }
 0x284   : > { %p1407_p10 = scmp.lt.u32.totalorder %s1405_s26, %s1401_s25  ;;  %p1409_p9 = scmp.lt.u32.totalorder %s1401_s25, %s1815_s14 }
 0x285   : > { %p1403_p6 = pnand %p1402_p5, %p1907_p7 }
 0x286   : > { %p1408_p8 = por %p1407_p10, %p1406_p3 }
 0x287   : > { %p1404_p13 = pneg %p1403_p6 }
 0x288   : > { %p1410_p0 = por %p1409_p9, %p1408_p8 }
 0x28a   : > { %p1411_p1 = pnand %p1410_p0, %p1404_p13 }
 0x28c   : > { %1414 = shalt.err (!%p1411_p1)
}
 0x28d   : > { %1195 = dma.vmem_to_hbm [thread:$0]  (%p1907_p7), %s1817_s23, 128, %s1815_s14, %s938_s20  }
 0x28e PF: > { %s976_s10 = sand.u32 1, %s1449_s27   ;;  %p1908_p11 = scmp.ne.s32.totalorder %s1900_s18, 0 }
 0x28f   : > { %p1909_p12 = scmp.ge.s32.totalorder %s1461_s30, 2  ;;  %s977_s24 = scalar_lea.sflag [#allocation4], %s976_s10 }
 0x291   : > { %p1206_p2 = pnand %p1909_p12, %p1908_p11 }
 0x293   : > { %1440 = dma.done.wait (!%p1206_p2), %s977_s24, 128  }
 0x294   : > { %1442 = vsyncadd (!%p1206_p2), %s977_s24, 4294967168  ;;  %s986_s21 = scalar_lea.sflag [#allocation9], %s976_s10 }
 0x295   : > { %1444 = dma.done.wait (!%p1206_p2), %s986_s21, 128  }
 0x296   : > { %1446 = vsyncadd (!%p1206_p2), %s986_s21, 4294967168  ;;  %s1910_s17 = sld [smem:[#allocation14_spill]]  ;;  %p28_p7 = scmp.ge.s32.totalorder %s1541_s11, 4  }
 0x297   : > { %s1911_s27 = smov %s1453_s28  ;;  %s1912_s28 = smov %s1457_s29 }
 0x298   : > { %s1914_s30 = smov %s1541_s11  ;;  %30 = sbr.rel (!%p28_p7) target bundleno = 11 (0xb), region = 126 }
 0x29c   : > { %s1913_s29 = smov %s1910_s17 }
 0x29f   :  { %991 = vsyncpa [#allocation3], 1 }
 0x2a0   :  { %993 = vsyncpa [#allocation3 + $0x1], 1 }
 0x2a1   :  { %994 = vsyncpa [#allocation6], 1 }
 0x2a2   :  { %996 = vsyncpa [#allocation6 + $0x1], 1 }
 0x2a3   :  { %997 = vsyncpa [#allocation4], 1 }
 0x2a4   :  { %999 = vsyncpa [#allocation4 + $0x1], 1 }
 0x2a5   :  { %1000 = vsyncpa [#allocation9], 1 }
 0x2a6   :  { %1002 = vsyncpa [#allocation9 + $0x1], 1 }

</bundles_post_ra>
